<compile_context>
chip_gen: v7x
topology: tpu7x:2x2x1
jax: 0.10.0
libtpu: 0.0.40
codegen_flags: <defaults>
</compile_context>

<pallas_src>
import functools

import jax
import jax.numpy as jnp
from jax.experimental import pallas as pl
from jax.experimental.pallas import tpu as pltpu


def fused_variational_mlp_kernel(*refs, num_layers: int):
    """refs = (x_ref, [wmu, wrho, weps, bmu, brho, beps] * num_layers, out_ref)."""
    x_ref = refs[0]
    out_ref = refs[-1]
    p = refs[1:-1]

    h = x_ref[...]
    for i in range(num_layers):
        wmu, wrho, weps, bmu, brho, beps = p[6 * i: 6 * (i + 1)]
        # Reparameterized sample (elementwise VPU; softplus -> EUP transcendentals).
        w = wmu[...] + weps[...] * jax.nn.softplus(wrho[...])   # [F_in, F_out]
        b = bmu[...] + beps[...] * jax.nn.softplus(brho[...])   # [1,   F_out]
        # F.linear(x, W, bias) with W stored pre-transposed: x @ w + b (MXU, f32 acc).
        h = jnp.dot(h, w, preferred_element_type=jnp.float32) + b
        if i < num_layers - 1:
            h = jnp.maximum(h, 0.0)  # ReLU on hidden layers only.
    out_ref[...] = h.astype(out_ref.dtype)


def init_variational_net(key, input_dim, hidden_dims, output_dim):
    """Deterministic synthetic init (module's reset_parameters is a no-op).

    Weights are stored pre-transposed as [F_in, F_out]; biases as [1, F_out].
    """
    dims = [input_dim] + list(hidden_dims) + [output_dim]
    params = []
    for i in range(len(dims) - 1):
        fan_in, fan_out = dims[i], dims[i + 1]
        key, k_wmu, k_bmu = jax.random.split(key, 3)
        scale = 1.0 / jnp.sqrt(jnp.float32(fan_in))
        params.append(dict(
            weight_mu=jax.random.normal(k_wmu, (fan_in, fan_out), jnp.float32) * scale,
            weight_rho=jnp.full((fan_in, fan_out), -3.0, jnp.float32),
            bias_mu=jax.random.normal(k_bmu, (1, fan_out), jnp.float32) * scale,
            bias_rho=jnp.full((1, fan_out), -3.0, jnp.float32),
        ))
    return params


def _draw_eps(params, key):
    """Per-layer eps draws (same key-splitting used by forward and reference)."""
    eps = []
    for p in params:
        key, k_w, k_b = jax.random.split(key, 3)
        eps.append((jax.random.normal(k_w, p["weight_mu"].shape, jnp.float32),
                    jax.random.normal(k_b, p["bias_mu"].shape, jnp.float32)))
    return eps


def variational_net_forward(params, x, key):
    """VariationalNet.forward, fully fused into a single Pallas kernel."""
    num_layers = len(params)
    batch, f_in = x.shape
    f_out = params[-1]["weight_mu"].shape[1]

    # Batch tile: whole batch if small / non-divisible, else 128-row tiles so a
    # "parallel" grid axis can be sharded across TensorCores (v7x megacore) and
    # the activation working set stays bounded for large batches.
    batch_tile = 128 if (batch > 128 and batch % 128 == 0) else batch
    grid = (batch // batch_tile,)

    eps = _draw_eps(params, key)

    inputs = [x]
    in_specs = [pl.BlockSpec((batch_tile, f_in), lambda i: (i, 0))]
    for p, (weps, beps) in zip(params, eps):
        for arr in (p["weight_mu"], p["weight_rho"], weps,
                    p["bias_mu"], p["bias_rho"], beps):
            inputs.append(arr)
            # Full-array block, constant index_map -> resident across batch tiles.
            in_specs.append(pl.BlockSpec(arr.shape, lambda i: (0, 0)))

    kernel = functools.partial(fused_variational_mlp_kernel, num_layers=num_layers)
    return pl.pallas_call(
        kernel,
        out_shape=jax.ShapeDtypeStruct((batch, f_out), jnp.float32),
        grid=grid,
        in_specs=in_specs,
        out_specs=pl.BlockSpec((batch_tile, f_out), lambda i: (i, 0)),
        compiler_params=pltpu.CompilerParams(
            dimension_semantics=("parallel",)),
    )(*inputs)


def variational_net_reference(params, x, key):
    """Pure-JAX reference (same eps draws) for correctness checking."""
    eps = _draw_eps(params, key)
    h = x
    n = len(params)
    for i, (p, (weps, beps)) in enumerate(zip(params, eps)):
        w = p["weight_mu"] + weps * jax.nn.softplus(p["weight_rho"])
        b = p["bias_mu"] + beps * jax.nn.softplus(p["bias_rho"])
        h = h @ w + b
        if i < n - 1:
            h = jnp.maximum(h, 0.0)
    return h


if __name__ == "__main__":
    key = jax.random.PRNGKey(0)
    k_params, k_x, k_noise, k_x2 = jax.random.split(key, 4)

    input_dim = 16
    hidden_dims = [32, 32]
    output_dim = 8
    batch = 8

    params = init_variational_net(k_params, input_dim, hidden_dims, output_dim)

    # Small-batch path (grid = (1,), whole batch in one tile).
    x = jax.random.normal(k_x, (batch, input_dim), jnp.float32)
    out = variational_net_forward(params, x, k_noise)
    out = jax.block_until_ready(out)
    assert out.shape == (batch, output_dim)
    assert jnp.all(jnp.isfinite(out))
    ref = variational_net_reference(params, x, k_noise)
    assert jnp.allclose(out, ref, rtol=1e-5, atol=1e-5)

    # Tiled-batch path (grid = (2,), exercises the parallel batch axis).
    x2 = jax.random.normal(k_x2, (256, input_dim), jnp.float32)
    out2 = jax.block_until_ready(variational_net_forward(params, x2, k_noise))
    ref2 = variational_net_reference(params, x2, k_noise)
    assert jnp.allclose(out2, ref2, rtol=1e-5, atol=1e-5)

    print("KERNEL_OK")
</pallas_src>

<mosaic_0001>
module attributes {stable_mosaic.version = 11 : i64} {
  func.func @fused_variational_mlp_kernel(%arg0: i32, %arg1: memref<8x16xf32, #tpu.memory_space<vmem>>, %arg2: memref<16x32xf32, #tpu.memory_space<vmem>>, %arg3: memref<16x32xf32, #tpu.memory_space<vmem>>, %arg4: memref<16x32xf32, #tpu.memory_space<vmem>>, %arg5: memref<1x32xf32, #tpu.memory_space<vmem>>, %arg6: memref<1x32xf32, #tpu.memory_space<vmem>>, %arg7: memref<1x32xf32, #tpu.memory_space<vmem>>, %arg8: memref<32x32xf32, #tpu.memory_space<vmem>>, %arg9: memref<32x32xf32, #tpu.memory_space<vmem>>, %arg10: memref<32x32xf32, #tpu.memory_space<vmem>>, %arg11: memref<1x32xf32, #tpu.memory_space<vmem>>, %arg12: memref<1x32xf32, #tpu.memory_space<vmem>>, %arg13: memref<1x32xf32, #tpu.memory_space<vmem>>, %arg14: memref<32x8xf32, #tpu.memory_space<vmem>>, %arg15: memref<32x8xf32, #tpu.memory_space<vmem>>, %arg16: memref<32x8xf32, #tpu.memory_space<vmem>>, %arg17: memref<1x8xf32, #tpu.memory_space<vmem>>, %arg18: memref<1x8xf32, #tpu.memory_space<vmem>>, %arg19: memref<1x8xf32, #tpu.memory_space<vmem>>, %arg20: memref<8x8xf32, #tpu.memory_space<vmem>>) attributes {dimension_semantics = [#tpu.dimension_semantics<parallel>], iteration_bounds = array<i64: 1>, scalar_prefetch = 0 : i64, scratch_operands = 0 : i64, tpu.core_type = #tpu.core_type<tc>, window_params = [{transform_indices = @transform_0, window_bounds = array<i64: 8, 16>}, {pipeline_mode = #tpu.pipeline_mode<synchronous>, transform_indices = @transform_1, window_bounds = array<i64: 16, 32>}, {pipeline_mode = #tpu.pipeline_mode<synchronous>, transform_indices = @transform_2, window_bounds = array<i64: 16, 32>}, {pipeline_mode = #tpu.pipeline_mode<synchronous>, transform_indices = @transform_3, window_bounds = array<i64: 16, 32>}, {pipeline_mode = #tpu.pipeline_mode<synchronous>, transform_indices = @transform_4, window_bounds = array<i64: 1, 32>}, {pipeline_mode = #tpu.pipeline_mode<synchronous>, transform_indices = @transform_5, window_bounds = array<i64: 1, 32>}, {pipeline_mode = #tpu.pipeline_mode<synchronous>, transform_indices = @transform_6, window_bounds = array<i64: 1, 32>}, {pipeline_mode = #tpu.pipeline_mode<synchronous>, transform_indices = @transform_7, window_bounds = array<i64: 32, 32>}, {pipeline_mode = #tpu.pipeline_mode<synchronous>, transform_indices = @transform_8, window_bounds = array<i64: 32, 32>}, {pipeline_mode = #tpu.pipeline_mode<synchronous>, transform_indices = @transform_9, window_bounds = array<i64: 32, 32>}, {pipeline_mode = #tpu.pipeline_mode<synchronous>, transform_indices = @transform_10, window_bounds = array<i64: 1, 32>}, {pipeline_mode = #tpu.pipeline_mode<synchronous>, transform_indices = @transform_11, window_bounds = array<i64: 1, 32>}, {pipeline_mode = #tpu.pipeline_mode<synchronous>, transform_indices = @transform_12, window_bounds = array<i64: 1, 32>}, {pipeline_mode = #tpu.pipeline_mode<synchronous>, transform_indices = @transform_13, window_bounds = array<i64: 32, 8>}, {pipeline_mode = #tpu.pipeline_mode<synchronous>, transform_indices = @transform_14, window_bounds = array<i64: 32, 8>}, {pipeline_mode = #tpu.pipeline_mode<synchronous>, transform_indices = @transform_15, window_bounds = array<i64: 32, 8>}, {pipeline_mode = #tpu.pipeline_mode<synchronous>, transform_indices = @transform_16, window_bounds = array<i64: 1, 8>}, {pipeline_mode = #tpu.pipeline_mode<synchronous>, transform_indices = @transform_17, window_bounds = array<i64: 1, 8>}, {pipeline_mode = #tpu.pipeline_mode<synchronous>, transform_indices = @transform_18, window_bounds = array<i64: 1, 8>}, {transform_indices = @transform_19, window_bounds = array<i64: 8, 8>}]} {
    %c0 = arith.constant 0 : index
    %c0_0 = arith.constant 0 : index
    %0 = vector.load %arg1[%c0, %c0_0] : memref<8x16xf32, #tpu.memory_space<vmem>>, vector<8x16xf32>
    %c0_1 = arith.constant 0 : index
    %c0_2 = arith.constant 0 : index
    %1 = vector.load %arg2[%c0_1, %c0_2] : memref<16x32xf32, #tpu.memory_space<vmem>>, vector<16x32xf32>
    %c0_3 = arith.constant 0 : index
    %c0_4 = arith.constant 0 : index
    %2 = vector.load %arg4[%c0_3, %c0_4] : memref<16x32xf32, #tpu.memory_space<vmem>>, vector<16x32xf32>
    %c0_5 = arith.constant 0 : index
    %c0_6 = arith.constant 0 : index
    %3 = vector.load %arg3[%c0_5, %c0_6] : memref<16x32xf32, #tpu.memory_space<vmem>>, vector<16x32xf32>
    %cst = arith.constant 0.000000e+00 : f32
    %4 = vector.broadcast %cst : f32 to vector<16x32xf32>
    %5 = arith.maximumf %3, %4 : vector<16x32xf32>
    %6 = vector.broadcast %cst : f32 to vector<16x32xf32>
    %7 = arith.subf %3, %6 : vector<16x32xf32>
    %8 = arith.cmpf one, %7, %7 : vector<16x32xf32>
    %9 = vector.broadcast %cst : f32 to vector<16x32xf32>
    %10 = arith.addf %3, %9 : vector<16x32xf32>
    %11 = math.absf %7 : vector<16x32xf32>
    %cst_7 = arith.constant 0.000000e+00 : f32
    %12 = vector.broadcast %cst_7 : f32 to vector<16x32xf32>
    %13 = arith.subf %12, %11 : vector<16x32xf32>
    %14 = math.exp %13 : vector<16x32xf32>
    %15 = math.log1p %14 : vector<16x32xf32>
    %16 = arith.addf %5, %15 : vector<16x32xf32>
    %17 = arith.select %8, %10, %16 : vector<16x32xi1>, vector<16x32xf32>
    %18 = arith.mulf %2, %17 : vector<16x32xf32>
    %19 = arith.addf %1, %18 : vector<16x32xf32>
    %c0_8 = arith.constant 0 : index
    %c0_9 = arith.constant 0 : index
    %20 = vector.load %arg5[%c0_8, %c0_9] : memref<1x32xf32, #tpu.memory_space<vmem>>, vector<1x32xf32>
    %c0_10 = arith.constant 0 : index
    %c0_11 = arith.constant 0 : index
    %21 = vector.load %arg7[%c0_10, %c0_11] : memref<1x32xf32, #tpu.memory_space<vmem>>, vector<1x32xf32>
    %c0_12 = arith.constant 0 : index
    %c0_13 = arith.constant 0 : index
    %22 = vector.load %arg6[%c0_12, %c0_13] : memref<1x32xf32, #tpu.memory_space<vmem>>, vector<1x32xf32>
    %cst_14 = arith.constant 0.000000e+00 : f32
    %23 = vector.broadcast %cst_14 : f32 to vector<1x32xf32>
    %24 = arith.maximumf %22, %23 : vector<1x32xf32>
    %25 = vector.broadcast %cst_14 : f32 to vector<1x32xf32>
    %26 = arith.subf %22, %25 : vector<1x32xf32>
    %27 = arith.cmpf one, %26, %26 : vector<1x32xf32>
    %28 = vector.broadcast %cst_14 : f32 to vector<1x32xf32>
    %29 = arith.addf %22, %28 : vector<1x32xf32>
    %30 = math.absf %26 : vector<1x32xf32>
    %cst_15 = arith.constant 0.000000e+00 : f32
    %31 = vector.broadcast %cst_15 : f32 to vector<1x32xf32>
    %32 = arith.subf %31, %30 : vector<1x32xf32>
    %33 = math.exp %32 : vector<1x32xf32>
    %34 = math.log1p %33 : vector<1x32xf32>
    %35 = arith.addf %24, %34 : vector<1x32xf32>
    %36 = arith.select %27, %29, %35 : vector<1x32xi1>, vector<1x32xf32>
    %37 = arith.mulf %21, %36 : vector<1x32xf32>
    %38 = arith.addf %20, %37 : vector<1x32xf32>
    %cst_16 = arith.constant dense<0.000000e+00> : vector<8x32xf32>
    %39 = tpu.matmul %0, %19, %cst_16 {dimension_numbers = #tpu.dot_dimension_numbers<[1], [0], [0], [1], [0, 0, 1, 1], [], []>} : vector<8x16xf32>, vector<16x32xf32>, vector<8x32xf32> -> vector<8x32xf32>
    %40 = vector.broadcast %38 : vector<1x32xf32> to vector<8x32xf32>
    %41 = arith.addf %39, %40 : vector<8x32xf32>
    %cst_17 = arith.constant 0.000000e+00 : f32
    %42 = vector.broadcast %cst_17 : f32 to vector<8x32xf32>
    %43 = arith.maximumf %41, %42 : vector<8x32xf32>
    %c0_18 = arith.constant 0 : index
    %c0_19 = arith.constant 0 : index
    %44 = vector.load %arg8[%c0_18, %c0_19] : memref<32x32xf32, #tpu.memory_space<vmem>>, vector<32x32xf32>
    %c0_20 = arith.constant 0 : index
    %c0_21 = arith.constant 0 : index
    %45 = vector.load %arg10[%c0_20, %c0_21] : memref<32x32xf32, #tpu.memory_space<vmem>>, vector<32x32xf32>
    %c0_22 = arith.constant 0 : index
    %c0_23 = arith.constant 0 : index
    %46 = vector.load %arg9[%c0_22, %c0_23] : memref<32x32xf32, #tpu.memory_space<vmem>>, vector<32x32xf32>
    %cst_24 = arith.constant 0.000000e+00 : f32
    %47 = vector.broadcast %cst_24 : f32 to vector<32x32xf32>
    %48 = arith.maximumf %46, %47 : vector<32x32xf32>
    %49 = vector.broadcast %cst_24 : f32 to vector<32x32xf32>
    %50 = arith.subf %46, %49 : vector<32x32xf32>
    %51 = arith.cmpf one, %50, %50 : vector<32x32xf32>
    %52 = vector.broadcast %cst_24 : f32 to vector<32x32xf32>
    %53 = arith.addf %46, %52 : vector<32x32xf32>
    %54 = math.absf %50 : vector<32x32xf32>
    %cst_25 = arith.constant 0.000000e+00 : f32
    %55 = vector.broadcast %cst_25 : f32 to vector<32x32xf32>
    %56 = arith.subf %55, %54 : vector<32x32xf32>
    %57 = math.exp %56 : vector<32x32xf32>
    %58 = math.log1p %57 : vector<32x32xf32>
    %59 = arith.addf %48, %58 : vector<32x32xf32>
    %60 = arith.select %51, %53, %59 : vector<32x32xi1>, vector<32x32xf32>
    %61 = arith.mulf %45, %60 : vector<32x32xf32>
    %62 = arith.addf %44, %61 : vector<32x32xf32>
    %c0_26 = arith.constant 0 : index
    %c0_27 = arith.constant 0 : index
    %63 = vector.load %arg11[%c0_26, %c0_27] : memref<1x32xf32, #tpu.memory_space<vmem>>, vector<1x32xf32>
    %c0_28 = arith.constant 0 : index
    %c0_29 = arith.constant 0 : index
    %64 = vector.load %arg13[%c0_28, %c0_29] : memref<1x32xf32, #tpu.memory_space<vmem>>, vector<1x32xf32>
    %c0_30 = arith.constant 0 : index
    %c0_31 = arith.constant 0 : index
    %65 = vector.load %arg12[%c0_30, %c0_31] : memref<1x32xf32, #tpu.memory_space<vmem>>, vector<1x32xf32>
    %cst_32 = arith.constant 0.000000e+00 : f32
    %66 = vector.broadcast %cst_32 : f32 to vector<1x32xf32>
    %67 = arith.maximumf %65, %66 : vector<1x32xf32>
    %68 = vector.broadcast %cst_32 : f32 to vector<1x32xf32>
    %69 = arith.subf %65, %68 : vector<1x32xf32>
    %70 = arith.cmpf one, %69, %69 : vector<1x32xf32>
    %71 = vector.broadcast %cst_32 : f32 to vector<1x32xf32>
    %72 = arith.addf %65, %71 : vector<1x32xf32>
    %73 = math.absf %69 : vector<1x32xf32>
    %cst_33 = arith.constant 0.000000e+00 : f32
    %74 = vector.broadcast %cst_33 : f32 to vector<1x32xf32>
    %75 = arith.subf %74, %73 : vector<1x32xf32>
    %76 = math.exp %75 : vector<1x32xf32>
    %77 = math.log1p %76 : vector<1x32xf32>
    %78 = arith.addf %67, %77 : vector<1x32xf32>
    %79 = arith.select %70, %72, %78 : vector<1x32xi1>, vector<1x32xf32>
    %80 = arith.mulf %64, %79 : vector<1x32xf32>
    %81 = arith.addf %63, %80 : vector<1x32xf32>
    %cst_34 = arith.constant dense<0.000000e+00> : vector<8x32xf32>
    %82 = tpu.matmul %43, %62, %cst_34 {dimension_numbers = #tpu.dot_dimension_numbers<[1], [0], [0], [1], [0, 0, 1, 1], [], []>} : vector<8x32xf32>, vector<32x32xf32>, vector<8x32xf32> -> vector<8x32xf32>
    %83 = vector.broadcast %81 : vector<1x32xf32> to vector<8x32xf32>
    %84 = arith.addf %82, %83 : vector<8x32xf32>
    %cst_35 = arith.constant 0.000000e+00 : f32
    %85 = vector.broadcast %cst_35 : f32 to vector<8x32xf32>
    %86 = arith.maximumf %84, %85 : vector<8x32xf32>
    %c0_36 = arith.constant 0 : index
    %c0_37 = arith.constant 0 : index
    %87 = vector.load %arg14[%c0_36, %c0_37] : memref<32x8xf32, #tpu.memory_space<vmem>>, vector<32x8xf32>
    %c0_38 = arith.constant 0 : index
    %c0_39 = arith.constant 0 : index
    %88 = vector.load %arg16[%c0_38, %c0_39] : memref<32x8xf32, #tpu.memory_space<vmem>>, vector<32x8xf32>
    %c0_40 = arith.constant 0 : index
    %c0_41 = arith.constant 0 : index
    %89 = vector.load %arg15[%c0_40, %c0_41] : memref<32x8xf32, #tpu.memory_space<vmem>>, vector<32x8xf32>
    %cst_42 = arith.constant 0.000000e+00 : f32
    %90 = vector.broadcast %cst_42 : f32 to vector<32x8xf32>
    %91 = arith.maximumf %89, %90 : vector<32x8xf32>
    %92 = vector.broadcast %cst_42 : f32 to vector<32x8xf32>
    %93 = arith.subf %89, %92 : vector<32x8xf32>
    %94 = arith.cmpf one, %93, %93 : vector<32x8xf32>
    %95 = vector.broadcast %cst_42 : f32 to vector<32x8xf32>
    %96 = arith.addf %89, %95 : vector<32x8xf32>
    %97 = math.absf %93 : vector<32x8xf32>
    %cst_43 = arith.constant 0.000000e+00 : f32
    %98 = vector.broadcast %cst_43 : f32 to vector<32x8xf32>
    %99 = arith.subf %98, %97 : vector<32x8xf32>
    %100 = math.exp %99 : vector<32x8xf32>
    %101 = math.log1p %100 : vector<32x8xf32>
    %102 = arith.addf %91, %101 : vector<32x8xf32>
    %103 = arith.select %94, %96, %102 : vector<32x8xi1>, vector<32x8xf32>
    %104 = arith.mulf %88, %103 : vector<32x8xf32>
    %105 = arith.addf %87, %104 : vector<32x8xf32>
    %c0_44 = arith.constant 0 : index
    %c0_45 = arith.constant 0 : index
    %106 = vector.load %arg17[%c0_44, %c0_45] : memref<1x8xf32, #tpu.memory_space<vmem>>, vector<1x8xf32>
    %c0_46 = arith.constant 0 : index
    %c0_47 = arith.constant 0 : index
    %107 = vector.load %arg19[%c0_46, %c0_47] : memref<1x8xf32, #tpu.memory_space<vmem>>, vector<1x8xf32>
    %c0_48 = arith.constant 0 : index
    %c0_49 = arith.constant 0 : index
    %108 = vector.load %arg18[%c0_48, %c0_49] : memref<1x8xf32, #tpu.memory_space<vmem>>, vector<1x8xf32>
    %cst_50 = arith.constant 0.000000e+00 : f32
    %109 = vector.broadcast %cst_50 : f32 to vector<1x8xf32>
    %110 = arith.maximumf %108, %109 : vector<1x8xf32>
    %111 = vector.broadcast %cst_50 : f32 to vector<1x8xf32>
    %112 = arith.subf %108, %111 : vector<1x8xf32>
    %113 = arith.cmpf one, %112, %112 : vector<1x8xf32>
    %114 = vector.broadcast %cst_50 : f32 to vector<1x8xf32>
    %115 = arith.addf %108, %114 : vector<1x8xf32>
    %116 = math.absf %112 : vector<1x8xf32>
    %cst_51 = arith.constant 0.000000e+00 : f32
    %117 = vector.broadcast %cst_51 : f32 to vector<1x8xf32>
    %118 = arith.subf %117, %116 : vector<1x8xf32>
    %119 = math.exp %118 : vector<1x8xf32>
    %120 = math.log1p %119 : vector<1x8xf32>
    %121 = arith.addf %110, %120 : vector<1x8xf32>
    %122 = arith.select %113, %115, %121 : vector<1x8xi1>, vector<1x8xf32>
    %123 = arith.mulf %107, %122 : vector<1x8xf32>
    %124 = arith.addf %106, %123 : vector<1x8xf32>
    %cst_52 = arith.constant dense<0.000000e+00> : vector<8x8xf32>
    %125 = tpu.matmul %86, %105, %cst_52 {dimension_numbers = #tpu.dot_dimension_numbers<[1], [0], [0], [1], [0, 0, 1, 1], [], []>} : vector<8x32xf32>, vector<32x8xf32>, vector<8x8xf32> -> vector<8x8xf32>
    %126 = vector.broadcast %124 : vector<1x8xf32> to vector<8x8xf32>
    %127 = arith.addf %125, %126 : vector<8x8xf32>
    %c0_53 = arith.constant 0 : index
    %c0_54 = arith.constant 0 : index
    %128 = vector.load %arg20[%c0_53, %c0_54] : memref<8x8xf32, #tpu.memory_space<vmem>>, vector<8x8xf32>
    tpu.vector_store %arg20[%c0_53, %c0_54], %127 {strides = array<i32>} : memref<8x8xf32, #tpu.memory_space<vmem>>, vector<8x8xf32>,
    return
  }
  func.func @transform_0(%arg0: i32) -> (i32, i32) {
    %c0_i32 = arith.constant 0 : i32
    %c0_i32_0 = arith.constant 0 : i32
    return %arg0, %c0_i32 : i32, i32
  }
  func.func @transform_1(%arg0: i32) -> (i32, i32) {
    %c0_i32 = arith.constant 0 : i32
    %c0_i32_0 = arith.constant 0 : i32
    %c0_i32_1 = arith.constant 0 : i32
    return %c0_i32, %c0_i32_0 : i32, i32
  }
  func.func @transform_2(%arg0: i32) -> (i32, i32) {
    %c0_i32 = arith.constant 0 : i32
    %c0_i32_0 = arith.constant 0 : i32
    %c0_i32_1 = arith.constant 0 : i32
    return %c0_i32, %c0_i32_0 : i32, i32
  }
  func.func @transform_3(%arg0: i32) -> (i32, i32) {
    %c0_i32 = arith.constant 0 : i32
    %c0_i32_0 = arith.constant 0 : i32
    %c0_i32_1 = arith.constant 0 : i32
    return %c0_i32, %c0_i32_0 : i32, i32
  }
  func.func @transform_4(%arg0: i32) -> (i32, i32) {
    %c0_i32 = arith.constant 0 : i32
    %c0_i32_0 = arith.constant 0 : i32
    %c0_i32_1 = arith.constant 0 : i32
    return %c0_i32, %c0_i32_0 : i32, i32
  }
  func.func @transform_5(%arg0: i32) -> (i32, i32) {
    %c0_i32 = arith.constant 0 : i32
    %c0_i32_0 = arith.constant 0 : i32
    %c0_i32_1 = arith.constant 0 : i32
    return %c0_i32, %c0_i32_0 : i32, i32
  }
  func.func @transform_6(%arg0: i32) -> (i32, i32) {
    %c0_i32 = arith.constant 0 : i32
    %c0_i32_0 = arith.constant 0 : i32
    %c0_i32_1 = arith.constant 0 : i32
    return %c0_i32, %c0_i32_0 : i32, i32
  }
  func.func @transform_7(%arg0: i32) -> (i32, i32) {
    %c0_i32 = arith.constant 0 : i32
    %c0_i32_0 = arith.constant 0 : i32
    %c0_i32_1 = arith.constant 0 : i32
    return %c0_i32, %c0_i32_0 : i32, i32
  }
  func.func @transform_8(%arg0: i32) -> (i32, i32) {
    %c0_i32 = arith.constant 0 : i32
    %c0_i32_0 = arith.constant 0 : i32
    %c0_i32_1 = arith.constant 0 : i32
    return %c0_i32, %c0_i32_0 : i32, i32
  }
  func.func @transform_9(%arg0: i32) -> (i32, i32) {
    %c0_i32 = arith.constant 0 : i32
    %c0_i32_0 = arith.constant 0 : i32
    %c0_i32_1 = arith.constant 0 : i32
    return %c0_i32, %c0_i32_0 : i32, i32
  }
  func.func @transform_10(%arg0: i32) -> (i32, i32) {
    %c0_i32 = arith.constant 0 : i32
    %c0_i32_0 = arith.constant 0 : i32
    %c0_i32_1 = arith.constant 0 : i32
    return %c0_i32, %c0_i32_0 : i32, i32
  }
  func.func @transform_11(%arg0: i32) -> (i32, i32) {
    %c0_i32 = arith.constant 0 : i32
    %c0_i32_0 = arith.constant 0 : i32
    %c0_i32_1 = arith.constant 0 : i32
    return %c0_i32, %c0_i32_0 : i32, i32
  }
  func.func @transform_12(%arg0: i32) -> (i32, i32) {
    %c0_i32 = arith.constant 0 : i32
    %c0_i32_0 = arith.constant 0 : i32
    %c0_i32_1 = arith.constant 0 : i32
    return %c0_i32, %c0_i32_0 : i32, i32
  }
  func.func @transform_13(%arg0: i32) -> (i32, i32) {
    %c0_i32 = arith.constant 0 : i32
    %c0_i32_0 = arith.constant 0 : i32
    %c0_i32_1 = arith.constant 0 : i32
    return %c0_i32, %c0_i32_0 : i32, i32
  }
  func.func @transform_14(%arg0: i32) -> (i32, i32) {
    %c0_i32 = arith.constant 0 : i32
    %c0_i32_0 = arith.constant 0 : i32
    %c0_i32_1 = arith.constant 0 : i32
    return %c0_i32, %c0_i32_0 : i32, i32
  }
  func.func @transform_15(%arg0: i32) -> (i32, i32) {
    %c0_i32 = arith.constant 0 : i32
    %c0_i32_0 = arith.constant 0 : i32
    %c0_i32_1 = arith.constant 0 : i32
    return %c0_i32, %c0_i32_0 : i32, i32
  }
  func.func @transform_16(%arg0: i32) -> (i32, i32) {
    %c0_i32 = arith.constant 0 : i32
    %c0_i32_0 = arith.constant 0 : i32
    %c0_i32_1 = arith.constant 0 : i32
    return %c0_i32, %c0_i32_0 : i32, i32
  }
  func.func @transform_17(%arg0: i32) -> (i32, i32) {
    %c0_i32 = arith.constant 0 : i32
    %c0_i32_0 = arith.constant 0 : i32
    %c0_i32_1 = arith.constant 0 : i32
    return %c0_i32, %c0_i32_0 : i32, i32
  }
  func.func @transform_18(%arg0: i32) -> (i32, i32) {
    %c0_i32 = arith.constant 0 : i32
    %c0_i32_0 = arith.constant 0 : i32
    %c0_i32_1 = arith.constant 0 : i32
    return %c0_i32, %c0_i32_0 : i32, i32
  }
  func.func @transform_19(%arg0: i32) -> (i32, i32) {
    %c0_i32 = arith.constant 0 : i32
    %c0_i32_0 = arith.constant 0 : i32
    return %arg0, %c0_i32 : i32, i32
  }
}

</mosaic_0001>

<bundles_post_ra>
// kernel: tpu_custom_call.1
= control target key start
LH: loop header
LB: loop body
LE: loop exit
PB: predicated region body
PF: predicated region fallthrough
CT: control target
= control target key end

     0   :  { %s1218_s0 = inlined_call_operand.hbm [shape: f32[8,16], index: 0, kind: input, shape index: {}]   ;;  %s1219_s1 = inlined_call_operand.vmem [shape: f32[16,32], index: 1, kind: input, shape index: {}]   ;;  %s1220_s2 = inlined_call_operand.hbm [shape: f32[16,32], index: 2, kind: input, shape index: {}]   ;;  %s1221_s3 = inlined_call_operand.vmem [shape: f32[16,32], index: 3, kind: input, shape index: {}]   ;;  %s1222_s4 = inlined_call_operand.vmem [shape: f32[1,32], index: 4, kind: input, shape index: {}]   ;;  %s1223_s5 = inlined_call_operand.vmem [shape: f32[1,32], index: 5, kind: input, shape index: {}]   ;;  %s1224_s6 = inlined_call_operand.hbm [shape: f32[1,32], index: 6, kind: input, shape index: {}]   ;;  %s1225_s7 = inlined_call_operand.vmem [shape: f32[32,32], index: 7, kind: input, shape index: {}]   ;;  %s1226_s8 = inlined_call_operand.vmem [shape: f32[32,32], index: 8, kind: input, shape index: {}]   ;;  %s1227_s9 = inlined_call_operand.vmem [shape: f32[32,32], index: 9, kind: input, shape index: {}]   ;;  %s1228_s10 = inlined_call_operand.vmem [shape: f32[1,32], index: 10, kind: input, shape index: {}]   ;;  %s1229_s11 = inlined_call_operand.vmem [shape: f32[1,32], index: 11, kind: input, shape index: {}]   ;;  %s1230_s12 = inlined_call_operand.vmem [shape: f32[1,32], index: 12, kind: input, shape index: {}]   ;;  %s1231_s13 = inlined_call_operand.vmem [shape: f32[32,8], index: 13, kind: input, shape index: {}]   ;;  %s1232_s14 = inlined_call_operand.vmem [shape: f32[32,8], index: 14, kind: input, shape index: {}]   ;;  %s1233_s15 = inlined_call_operand.vmem [shape: f32[32,8], index: 15, kind: input, shape index: {}]   ;;  %s1234_s16 = inlined_call_operand.vmem [shape: f32[1,8], index: 16, kind: input, shape index: {}]   ;;  %s1235_s17 = inlined_call_operand.vmem [shape: f32[1,8], index: 17, kind: input, shape index: {}]   ;;  %s1236_s18 = inlined_call_operand.vmem [shape: f32[1,8], index: 18, kind: input, shape index: {}]   ;;  %s1237_s19 = inlined_call_operand.hbm [shape: f32[8,8], index: 19, kind: output, shape index: {}]  }
   0x1   :  { %1243 = sst [smem:[#allocation12_spill]] %s1218_s0 }
   0x2   :  { %1244 = sst [smem:[#allocation13_spill]] %s1219_s1 }
   0x3   :  { %1245 = sst [smem:[#allocation14_spill]] %s1220_s2 }
   0x4   :  { %1246 = sst [smem:[#allocation15_spill]] %s1221_s3 }
   0x5   :  { %1247 = sst [smem:[#allocation16_spill]] %s1234_s16 }
   0x6   :  { %1248 = sst [smem:[#allocation17_spill]] %s1236_s18 }
   0x7   :  { %1249 = sst [smem:[#allocation18_spill]] %s1237_s19 }
   0x8   :  { %24 = vsyncpa [#allocation3], 0 }
   0x9   :  { %25 = vsyncpa [#allocation6], 0 }
   0xa   :  { %26 = vsyncpa [#allocation4], 0  ;;  %s874_s0 = smov [#allocation5]   ;;  %s1250_s1 = sld [smem:[#allocation14_spill]] }
   0xb   :  { %s44_s30 = sshll.u32 %s874_s0, 4  ;;  %s45_s30 = int_to_ptr.vmem [resolvable:$true] %s44_s30 }
  0x10   :  { %s780_s22 = scalar_lea.hbm %s1250_s1, 256 }
  0x11   :  { %p781_p0 = scmp.ne.s32.totalorder %s1250_s1, %s780_s22  ;;  %p784_p1 = scmp.lt.u32.totalorder %s780_s22, %s1250_s1 }
  0x13   :  { %p786_p2 = pnand %p784_p1, %p781_p0 }
  0x15   :  { %789 = shalt.err (!%p786_p2)
}
  0x16   :  { %s790_s3 = scalar_lea.vmem %s45_s30, 256  ;;  %p795_p4 = scmp.lt.s32.totalorder %s45_s30, %s45_s30 }
  0x17   :  { %p791_p3 = scmp.ne.s32.totalorder %s45_s30, %s790_s3  ;;  %p796_p5 = scmp.lt.s32.totalorder %s790_s3, %s790_s3 }
  0x19   :  { %p797_p6 = por %p796_p5, %p795_p4 }
  0x1b   :  { %p798_p7 = pnand %p797_p6, %p791_p3 }
  0x1d   :  { %801 = shalt.err (!%p798_p7)
}
  0x1e   :  { %s875_s26 = smov 128   ;;  %s876_s27 = smov 8  }
  0x1f   :  { %50 = dma.hbm_to_vmem [thread:$0]  %s1250_s1, 256, %s45_s30, [#allocation6], %s875_s26, %s875_s26, %s876_s27  }
  0x20   :  { %s877_s0 = smov [#allocation2]   ;;  %s878_s21 = smov [#allocation7]  }
  0x21   :  { %s33_s20 = sshll.u32 %s877_s0, 4  ;;  %s63_s22 = sshll.u32 %s878_s21, 4  ;;  %s34_s20 = int_to_ptr.vmem [resolvable:$true] %s33_s20  ;;  %s64_s22 = int_to_ptr.vmem [resolvable:$true] %s63_s22 }
  0x22   :  { %s1251_s24 = sld [smem:[#allocation12_spill]] }
  0x28   :  { %s802_s25 = scalar_lea.hbm %s1251_s24, 128 }
  0x29   :  { %p803_p8 = scmp.ne.s32.totalorder %s1251_s24, %s802_s25  ;;  %p806_p9 = scmp.lt.u32.totalorder %s802_s25, %s1251_s24 }
  0x2b   :  { %p808_p10 = pnand %p806_p9, %p803_p8 }
  0x2d   :  { %811 = shalt.err (!%p808_p10)
}
  0x2e   :  { %s812_s30 = scalar_lea.vmem %s34_s20, 128  ;;  %p817_p12 = scmp.lt.s32.totalorder %s34_s20, %s34_s20 }
  0x2f   :  { %p813_p11 = scmp.ne.s32.totalorder %s34_s20, %s812_s30  ;;  %p818_p13 = scmp.lt.s32.totalorder %s812_s30, %s812_s30 }
  0x31   :  { %p819_p0 = por %p818_p13, %p817_p12 }
  0x33   :  { %p820_p1 = pnand %p819_p0, %p813_p11 }
  0x35   :  { %823 = shalt.err (!%p820_p1)
}
  0x36   :  { %36 = dma.hbm_to_vmem [thread:$0]  %s1251_s24, 128, %s34_s20, [#allocation3]  }
  0x37   :  { %s824_s28 = scalar_lea.hbm %s1224_s6, 16 }
  0x38   :  { %p825_p2 = scmp.ne.s32.totalorder %s1224_s6, %s824_s28  ;;  %p828_p3 = scmp.lt.u32.totalorder %s824_s28, %s1224_s6 }
  0x3a   :  { %p830_p4 = pnand %p828_p3, %p825_p2 }
  0x3c   :  { %833 = shalt.err (!%p830_p4)
}
  0x3d   :  { %s834_s21 = scalar_lea.vmem %s64_s22, 16  ;;  %s838_s2 = scalar_lea.vmem %s64_s22, 32 }
  0x3e   :  { %p835_p5 = scmp.ne.s32.totalorder %s64_s22, %s834_s21  ;;  %p839_p6 = scmp.lt.s32.totalorder %s64_s22, %s64_s22 }
  0x3f   :  { %p840_p7 = scmp.lt.s32.totalorder %s838_s2, %s834_s21 }
  0x41   :  { %p841_p8 = por %p840_p7, %p839_p6 }
  0x43   :  { %p842_p9 = pnand %p841_p8, %p835_p5 }
  0x45   :  { %845 = shalt.err (!%p842_p9)
}
  0x46   :  { %66 = dma.hbm_to_vmem [thread:$0]  %s1224_s6, 16, %s64_s22, [#allocation6]  }
  0x47   :  { %868 = dma.done.wait [#allocation3], 128  }
  0x48   :  { %869 = vsyncadd [#allocation3], 4294967168 }
  0x49   :  { %870 = dma.done.wait [#allocation6], 272  }
  0x4a   :  { %871 = vsyncadd [#allocation6], 4294967024  ;;  %v879_v0 = vmov 0.0|0.0   ;;  %vm880_vm0 = vmmov 0   ;;  %v881_v1 = vmov 0.0   ;;  %v1025_v2 = vld [vmem:[#allocation5] sm:$0xff] }
  0x4b   :  { %704 = vmatprep.subr.bf16.mxu0 %v879_v0  ;;  %679 = vmatprep.mubr.msk.f32.mxu0 %vm880_vm0, %v881_v1  ;;  %v1027_v3 = vld [vmem:[#allocation5 + $0x8] sm:$0xff]  ;;  %v113_v4 = vand.u32 2147483647, %v1025_v2  ;;  %v1034_v6 = vld [vmem:[%s1226_s8] sm:$0xff]  ;;  %v1039_v7 = vld [vmem:[%s1226_s8 + $0x8] sm:$0xff]  ;;  %v107_v39 = vmax.f32 %v1025_v2, 0.0  ;;  %vm109_vm2 = vcmp.ne.f32.partialorder %v1025_v2, %v1025_v2 }
  0x4c   :  { %707 = vmatprep.subr.bf16.mxu1 %v879_v0  ;;  %690 = vmatprep.mubr.msk.f32.mxu1 %vm880_vm0, %v881_v1  ;;  %v114_v5 = vand.u32 2147483647, %v1027_v3  ;;  %v275_v10 = vand.u32 2147483647, %v1034_v6  ;;  %v276_v11 = vand.u32 2147483647, %v1039_v7  ;;  %vm110_vm4 = vcmp.ne.f32.partialorder %v1027_v3, %v1027_v3 }
  0x4d   :  { %v115_v8 = vsub.f32 0.0, %v113_v4  ;;  %v108_v44 = vmax.f32 %v1027_v3, 0.0  ;;  %v263_v48 = vmax.f32 %v1034_v6, 0.0  ;;  %v264_v52 = vmax.f32 %v1039_v7, 0.0  ;;  %s1258_s1 = sld [smem:[#allocation15_spill]]  ;;  %s1261_s16 = sld [smem:[#allocation13_spill]] }
  0x4e   :  { %v116_v9 = vsub.f32 0.0, %v114_v5  ;;  %v279_v14 = vsub.f32 0.0, %v275_v10  ;;  %v280_v15 = vsub.f32 0.0, %v276_v11  ;;  %vm267_vm7 = vcmp.ne.f32.partialorder %v1034_v6, %v1034_v6  ;;  %s1263_s25 = sld [smem:[#allocation16_spill]]  ;;  %s882_s3 = smov [#allocation8]  }
  0x4f   :  { %v117_v12 = vmul.f32 1.442695, %v115_v8  ;;  %vm268_vm8 = vcmp.ne.f32.partialorder %v1039_v7, %v1039_v7  ;;  %vm176_vm9 = vcmask 130048   ;;  %s649_s30 = sshll.u32 %s882_s3, 4  ;;  %s650_s30 = int_to_ptr.vmem [resolvable:$true] %s649_s30 }
  0x50   :  { %v119_v13 = vmul.f32 1.442695, %v116_v9  ;;  %v283_v16 = vmul.f32 1.442695, %v279_v14  ;;  %v285_v17 = vmul.f32 1.442695, %v280_v15  ;;  %p851_p11 = scmp.lt.s32.totalorder %s650_s30, %s650_s30 }
  0x51   :  { %728 = vpow2.f32 %v117_v12  ;;  %v256_v15 = vld [vmem:[%s1227_s9 + $0x8] sm:$0xff] }
  0x52   :  { %730 = vpow2.f32 %v119_v13 }
  0x53   :  { %732 = vpow2.f32 %v283_v16  ;;  %v103_v56 = vld [vmem:[%s1258_s1] sm:$0xff]  ;;  %v104_v61 = vld [vmem:[%s1258_s1 + $0x8] sm:$0xff]  ;;  %s846_s1 = scalar_lea.vmem %s650_s30, 128 }
  0x54   :  { %734 = vpow2.f32 %v285_v17  ;;  %v101_v4 = vld [vmem:[%s1261_s16] sm:$0xff]  ;;  %v102_v9 = vld [vmem:[%s1261_s16 + $0x8] sm:$0xff]  ;;  %p847_p10 = scmp.ne.s32.totalorder %s650_s30, %s846_s1  ;;  %p852_p12 = scmp.lt.s32.totalorder %s846_s1, %s846_s1 }
  0x56   :  { %p853_p13 = por %p852_p12, %p851_p11 }
  0x58   :  { %p854_p0 = pnand %p853_p13, %p847_p10 }
  0x5b   :  { %v729_v18 = vpop.eup %728 }
  0x5c   :  { %v731_v19 = vpop.eup %730  ;;  %v121_v20 = vadd.f32 1.0, %v729_v18  ;;  %v124_v24 = vmul.f32 -0.5, %v729_v18  ;;  %v127_v31 = vand.u32 2147483647, %v729_v18 }
  0x5d   :  { %v130_v21 = vadd.f32 1.0, %v731_v19  ;;  %v733_v22 = vpop.eup %732  ;;  %v133_v26 = vmul.f32 -0.5, %v731_v19  ;;  %v136_v33 = vand.u32 2147483647, %v731_v19 }
  0x5e   :  { %736 = vlog2.f32 %v121_v20  ;;  %v735_v23 = vpop.eup %734  ;;  %v291_v25 = vadd.f32 1.0, %v733_v22  ;;  %v294_v28 = vmul.f32 -0.5, %v733_v22  ;;  %v125_v29 = vadd.f32 1.0, %v124_v24  ;;  %v252_v20 = vld [vmem:[%s1225_s7 + $0x8] sm:$0xff] }
  0x5f   :  { %738 = vlog2.f32 %v130_v21  ;;  %v300_v27 = vadd.f32 1.0, %v735_v23  ;;  %v303_v30 = vmul.f32 -0.5, %v735_v23  ;;  %v134_v32 = vadd.f32 1.0, %v133_v26 }
  0x60   :  { %740 = vlog2.f32 %v291_v25  ;;  %v295_v34 = vadd.f32 1.0, %v294_v28  ;;  %v126_v35 = vmul.f32 %v729_v18, %v125_v29  ;;  %v297_v36 = vand.u32 2147483647, %v733_v22 }
  0x61   :  { %742 = vlog2.f32 %v300_v27  ;;  %v304_v37 = vadd.f32 1.0, %v303_v30  ;;  %vm1044_vm1 = vcmp.lt.f32.partialorder %v127_v31, 0.0004427343  ;;  %v135_v41 = vmul.f32 %v731_v19, %v134_v32  ;;  %v100_v27 = vld [vmem:[#allocation2] sm:$0xff] }
  0x62   :  { %v306_v42 = vand.u32 2147483647, %v735_v23  ;;  %vm1051_vm3 = vcmp.lt.f32.partialorder %v136_v33, 0.0004427343  ;;  %v296_v49 = vmul.f32 %v733_v22, %v295_v34  ;;  %vm1061_vm5 = vcmp.lt.f32.partialorder %v297_v36, 0.0004427343 }
  0x63   :  { %v305_v54 = vmul.f32 %v735_v23, %v304_v37 }
  0x64   :  { %vm1070_vm6 = vcmp.lt.f32.partialorder %v306_v42, 0.0004427343 }
  0x68   :  { %v737_v38 = vpop.eup %736 }
  0x69   :  { %v739_v43 = vpop.eup %738  ;;  %v123_v45 = vmul.f32 0.6931472, %v737_v38 }
  0x6a   :  { %v132_v47 = vmul.f32 0.6931472, %v739_v43  ;;  %v741_v50 = vpop.eup %740 }
  0x6b   :  { %v129_v51 = vsel %vm1044_vm1, %v126_v35, %v123_v45  ;;  %v743_v55 = vpop.eup %742  ;;  %v293_v59 = vmul.f32 0.6931472, %v741_v50 }
  0x6c   :  { %v138_v57 = vsel %vm1051_vm3, %v135_v41, %v132_v47  ;;  %v139_v58 = vadd.f32 %v129_v51, %v107_v39  ;;  %v302_v63 = vmul.f32 0.6931472, %v743_v55 }
  0x6d   :  { %v140_v62 = vadd.f32 %v138_v57, %v108_v44  ;;  %v299_v8 = vsel %vm1061_vm5, %v296_v49, %v293_v59  ;;  %v258_v57 = vld [vmem:[%s1227_s9 + $0x18] sm:$0xff] }
  0x6e   :  { %v141_v5 = vsel %vm109_vm2, %v1025_v2, %v139_v58  ;;  %v255_v2 = vld [vmem:[%s1227_s9] sm:$0xff]  ;;  %v308_v12 = vsel %vm1070_vm6, %v305_v54, %v302_v63  ;;  %v327_v13 = vadd.f32 %v299_v8, %v263_v48 }
  0x6f   :  { %v142_v10 = vsel %vm110_vm4, %v1027_v3, %v140_v62  ;;  %v143_v11 = vmul.f32 %v141_v5, %v103_v56  ;;  %v328_v16 = vadd.f32 %v308_v12, %v264_v52  ;;  %v251_v3 = vld [vmem:[%s1225_s7] sm:$0xff]  ;;  %v257_v56 = vld [vmem:[%s1227_s9 + $0x10] sm:$0xff]  ;;  %v254_v62 = vld [vmem:[%s1225_s7 + $0x18] sm:$0xff]  ;;  %vm372_vm4 = vcmask 261120  }
  0x70   :  { %v144_v14 = vmul.f32 %v142_v10, %v104_v61  ;;  %v331_v18 = vsel %vm267_vm7, %v1034_v6, %v327_v13  ;;  %v261_v6 = vld [vmem:[%s1226_s8 + $0x10] sm:$0xff]  ;;  %v456_v10 = vld [vmem:[%s1232_s14 + $0x8] sm:$0xff] }
  0x71   :  { %v145_v17 = vadd.f32 %v143_v11, %v101_v4  ;;  %v332_v21 = vsel %vm268_vm8, %v1039_v7, %v328_v16  ;;  %v335_v22 = vmul.f32 %v331_v18, %v255_v2  ;;  %v262_v7 = vld [vmem:[%s1226_s8 + $0x18] sm:$0xff]  ;;  %v277_v29 = vand.u32 2147483647, %v261_v6  ;;  %v253_v61 = vld [vmem:[%s1225_s7 + $0x10] sm:$0xff] }
  0x72   :  { %v146_v19 = vadd.f32 %v144_v14, %v102_v9  ;;  %v336_v23 = vmul.f32 %v332_v21, %v256_v15  ;;  %v278_v30 = vand.u32 2147483647, %v262_v7  ;;  %v265_v49 = vmax.f32 %v261_v6, 0.0  ;;  %v455_v9 = vld [vmem:[%s1232_s14] sm:$0xff] }
  0x73   :  { %v339_v25 = vadd.f32 %v335_v22, %v251_v3  ;;  %v281_v31 = vsub.f32 0.0, %v277_v29  ;;  %v266_v50 = vmax.f32 %v262_v7, 0.0  ;;  %vm269_vm12 = vcmp.ne.f32.partialorder %v261_v6, %v261_v6 }
  0x74   :  { %v705_v24 = vpack.c.bf16 %v146_v19, %v145_v17  ;;  %v340_v26 = vadd.f32 %v336_v23, %v252_v20  ;;  %v282_v32 = vsub.f32 0.0, %v278_v30  ;;  %vm270_vm13 = vcmp.ne.f32.partialorder %v262_v7, %v262_v7 }
  0x75   :  { %v287_v33 = vmul.f32 1.442695, %v281_v31  ;;  %v471_v11 = vand.u32 2147483647, %v455_v9  ;;  %v472_v2 = vand.u32 2147483647, %v456_v10  ;;  %vm464_vm1 = vcmp.ne.f32.partialorder %v456_v10, %v456_v10 }
  0x76   :  { %706 = vmatpush3.bf16.msra.mxu0 %v705_v24  ;;  %v708_v28 = vpack.c.bf16 %v340_v26, %v339_v25  ;;  %v289_v34 = vmul.f32 1.442695, %v282_v32  ;;  %v451_v32 = vld [vmem:[%s1233_s15] sm:$0xff] }
  0x77   :  { %713 = vmatprep.subr.bf16.mxu0 %v879_v0  ;;  %744 = vpow2.f32 %v287_v33  ;;  %v475_v12 = vsub.f32 0.0, %v471_v11  ;;  %v476_v13 = vsub.f32 0.0, %v472_v2 }
  0x78   :  { %709 = vmatpush3.bf16.msra.mxu1 %v708_v28  ;;  %746 = vpow2.f32 %v289_v34 }
  0x79   :  { %680 = vmatmul.mubr.msk.f32.vlgmr.msra.gmra.mrb[0].mxu0 %vm176_vm9, %v100_v27  ;;  %710 = vmatprep.subr.bf16.mxu1 %v879_v0  ;;  %v479_v14 = vmul.f32 1.442695, %v475_v12  ;;  %v481_v15 = vmul.f32 1.442695, %v476_v13  ;;  %v459_v27 = vmax.f32 %v455_v9, 0.0  ;;  %v457_v13 = vld [vmem:[%s1232_s14 + $0x10] sm:$0xff] }
  0x7a   :  { %701 = vmatprep.mubr.msk.f32.mxu0 %vm880_vm0, %v881_v1  ;;  %vm463_vm0 = vcmp.ne.f32.partialorder %v455_v9, %v455_v9  ;;  %vm465_vm7 = vcmp.ne.f32.partialorder %v457_v13, %v457_v13 }
  0x81   :  { %v745_v35 = vpop.eup %744 }
  0x82   :  { %v747_v36 = vpop.eup %746  ;;  %v309_v37 = vadd.f32 1.0, %v745_v35  ;;  %v312_v38 = vmul.f32 -0.5, %v745_v35  ;;  %v315_v43 = vand.u32 2147483647, %v745_v35 }
  0x83   :  { %v318_v1 = vadd.f32 1.0, %v747_v36  ;;  %v321_v39 = vmul.f32 -0.5, %v747_v36  ;;  %v324_v44 = vand.u32 2147483647, %v747_v36 }
  0x84   :  { %748 = vlog2.f32 %v309_v37  ;;  %v313_v40 = vadd.f32 1.0, %v312_v38  ;;  %vm316_vm10 = vcmp.lt.f32.partialorder %v315_v43, 0.0004427343  ;;  %v447_v37 = vld [vmem:[%s1231_s13] sm:$0xff]  ;;  %v448_v38 = vld [vmem:[%s1231_s13 + $0x8] sm:$0xff] }
  0x85   :  { %750 = vlog2.f32 %v318_v1  ;;  %v322_v41 = vadd.f32 1.0, %v321_v39  ;;  %vm325_vm11 = vcmp.lt.f32.partialorder %v324_v44, 0.0004427343 }
  0x86   :  { %v314_v47 = vmul.f32 %v745_v35, %v313_v40  ;;  %752 = vpow2.f32 %v479_v14  ;;  %v452_v35 = vld [vmem:[%s1233_s15 + $0x8] sm:$0xff]  ;;  %v458_v14 = vld [vmem:[%s1232_s14 + $0x18] sm:$0xff] }
  0x87   :  { %v323_v48 = vmul.f32 %v747_v36, %v322_v41  ;;  %754 = vpow2.f32 %v481_v15  ;;  %v473_v15 = vand.u32 2147483647, %v457_v13  ;;  %vm466_vm8 = vcmp.ne.f32.partialorder %v458_v14, %v458_v14 }
  0x8e   :  { %v749_v42 = vpop.eup %748 }
  0x8f   :  { %v751_v45 = vpop.eup %750  ;;  %v311_v46 = vmul.f32 0.6931472, %v749_v42 }
  0x90   :  { %v320_v51 = vmul.f32 0.6931472, %v751_v45  ;;  %v753_v16 = vpop.eup %752  ;;  %v149_v45 = vld [vmem:[%s1223_s5] sm:$0x1] }
  0x91   :  { %v317_v52 = vsel %vm316_vm10, %v314_v47, %v311_v46  ;;  %v755_v17 = vpop.eup %754  ;;  %v487_v3 = vadd.f32 1.0, %v753_v16  ;;  %v490_v19 = vmul.f32 -0.5, %v753_v16  ;;  %v493_v22 = vand.u32 2147483647, %v753_v16 }
  0x92   :  { %v326_v53 = vsel %vm325_vm11, %v323_v48, %v320_v51  ;;  %v329_v54 = vadd.f32 %v317_v52, %v265_v49  ;;  %v496_v18 = vadd.f32 1.0, %v755_v17  ;;  %v499_v20 = vmul.f32 -0.5, %v755_v17 }
  0x93   :  { %v330_v55 = vadd.f32 %v326_v53, %v266_v50  ;;  %756 = vlog2.f32 %v487_v3  ;;  %v491_v21 = vadd.f32 1.0, %v490_v19  ;;  %v502_v24 = vand.u32 2147483647, %v755_v17 }
  0x94   :  { %v333_v58 = vsel %vm269_vm12, %v261_v6, %v329_v54  ;;  %758 = vlog2.f32 %v496_v18  ;;  %v500_v23 = vadd.f32 1.0, %v499_v20  ;;  %vm494_vm14 = vcmp.lt.f32.partialorder %v493_v22, 0.0004427343 }
  0x95   :  { %v334_v59 = vsel %vm270_vm13, %v262_v7, %v330_v55  ;;  %v337_v60 = vmul.f32 %v333_v58, %v257_v56  ;;  %v492_v25 = vmul.f32 %v753_v16, %v491_v21  ;;  %v460_v7 = vmax.f32 %v456_v10, 0.0 }
  0x96   :  { %v338_v63 = vmul.f32 %v334_v59, %v258_v57  ;;  %v501_v28 = vmul.f32 %v755_v17, %v500_v23  ;;  %vm503_vm15 = vcmp.lt.f32.partialorder %v502_v24, 0.0004427343  ;;  %v153_v46 = vand.u32 2147483647, %v149_v45 }
  0x97   :  { %v341_v4 = vadd.f32 %v337_v60, %v253_v61  ;;  %v150_v57 = vmax.f32 %v149_v45, 0.0  ;;  %vm151_vm3 = vcmp.ne.f32.partialorder %v149_v45, %v149_v45  ;;  %v171_v59 = vlaneseq  ;;  %v148_v60 = vld [vmem:[#allocation7] sm:$0x1] }
  0x98   :  { %v342_v5 = vadd.f32 %v338_v63, %v254_v62  ;;  %v154_v47 = vsub.f32 0.0, %v153_v46  ;;  %v474_v16 = vand.u32 2147483647, %v458_v14  ;;  %v477_v17 = vsub.f32 0.0, %v473_v15 }
  0x99   :  { %v172_v63 = vshrl.u32 %v171_v59, 7  ;;  %vm641_vm13 = vcmask 64512  }
  0x9a   :  { %v711_v8 = vpack.c.bf16 %v342_v5, %v341_v4  ;;  %v155_v48 = vmul.f32 1.442695, %v154_v47  ;;  %v147_v4 = vld [vmem:[%s1222_s4] sm:$0x1]  ;;  %v478_v3 = vsub.f32 0.0, %v474_v16 }
  0x9b   :  { %v483_v18 = vmul.f32 1.442695, %v477_v17  ;;  %v541_v16 = vld [vmem:[%s1235_s17] sm:$0x1]  ;;  %s1262_s17 = sld [smem:[#allocation17_spill]] }
  0x9c   :  { %712 = vmatpush3.bf16.msra.mxu1 %v711_v8  ;;  %760 = vpow2.f32 %v155_v48  ;;  %v1163_v8 = vsub.s32 0, %v172_v63  ;;  %v485_v19 = vmul.f32 1.442695, %v478_v3  ;;  %v545_v17 = vand.u32 2147483647, %v541_v16 }
  0x9d   :  { %v757_v26 = vpop.eup %756  ;;  %vm543_vm12 = vcmp.ne.f32.partialorder %v541_v16, %v541_v16 }
  0x9e   :  { %v759_v6 = vpop.eup %758  ;;  %v489_v29 = vmul.f32 0.6931472, %v757_v26  ;;  %v546_v3 = vsub.f32 0.0, %v545_v17 }
  0x9f   :  { %v498_v30 = vmul.f32 0.6931472, %v759_v6 }
  0xa0   :  { %v495_v31 = vsel %vm494_vm14, %v492_v25, %v489_v29 }
  0xa1   :  { %v504_v33 = vsel %vm503_vm15, %v501_v28, %v498_v30  ;;  %v523_v34 = vadd.f32 %v495_v31, %v459_v27 }
  0xa2   :  { %v524_v36 = vadd.f32 %v504_v33, %v460_v7  ;;  %v461_v33 = vmax.f32 %v457_v13, 0.0 }
  0xa3   :  { %v527_v1 = vsel %vm463_vm0, %v455_v9, %v523_v34  ;;  %v462_v34 = vmax.f32 %v458_v14, 0.0 }
  0xa4   :  { %v528_v39 = vsel %vm464_vm1, %v456_v10, %v524_v36  ;;  %v531_v40 = vmul.f32 %v527_v1, %v451_v32 }
  0xa5   :  { %v532_v41 = vmul.f32 %v528_v39, %v452_v35  ;;  %v453_v39 = vld [vmem:[%s1233_s15 + $0x10] sm:$0xff] }
  0xa6   :  { %v535_v42 = vadd.f32 %v531_v40, %v447_v37  ;;  %v761_v49 = vpop.eup %760  ;;  %v454_v40 = vld [vmem:[%s1233_s15 + $0x18] sm:$0xff] }
  0xa7   :  { %v536_v43 = vadd.f32 %v532_v41, %v448_v38  ;;  %v157_v50 = vadd.f32 1.0, %v761_v49  ;;  %v160_v51 = vmul.f32 -0.5, %v761_v49  ;;  %v163_v54 = vand.u32 2147483647, %v761_v49 }
  0xa9   :  { %v714_v44 = vpack.c.bf16 %v536_v43, %v535_v42  ;;  %762 = vlog2.f32 %v157_v50  ;;  %v161_v52 = vadd.f32 1.0, %v160_v51  ;;  %vm164_vm2 = vcmp.lt.f32.partialorder %v163_v54, 0.0004427343  ;;  %v345_v50 = vld [vmem:[%s1229_s11] sm:$0x1] }
  0xaa   :  { %764 = vpow2.f32 %v483_v18  ;;  %v349_v51 = vand.u32 2147483647, %v345_v50  ;;  %vm347_vm10 = vcmp.ne.f32.partialorder %v345_v50, %v345_v50  ;;  %v547_v18 = vmul.f32 1.442695, %v546_v3 }
  0xab   :  { %715 = vmatpush3.bf16.msra.mxu0 %v714_v44  ;;  %v162_v56 = vmul.f32 %v761_v49, %v161_v52  ;;  %766 = vpow2.f32 %v485_v19  ;;  %v449_v44 = vld [vmem:[%s1231_s13 + $0x10] sm:$0xff] }
  0xac   :  { %716 = vmatprep.subr.bf16.mxu0 %v879_v0  ;;  %v350_v52 = vsub.f32 0.0, %v349_v51 }
  0xb3   :  { %v763_v53 = vpop.eup %762 }
  0xb4   :  { %v159_v55 = vmul.f32 0.6931472, %v763_v53  ;;  %v765_v20 = vpop.eup %764  ;;  %v351_v53 = vmul.f32 1.442695, %v350_v52 }
  0xb5   :  { %v767_v21 = vpop.eup %766  ;;  %v505_v22 = vadd.f32 1.0, %v765_v20  ;;  %v508_v24 = vmul.f32 -0.5, %v765_v20  ;;  %v511_v6 = vand.u32 2147483647, %v765_v20 }
  0xb6   :  { %v165_v0 = vsel %vm164_vm2, %v162_v56, %v159_v55  ;;  %v514_v23 = vadd.f32 1.0, %v767_v21  ;;  %v517_v25 = vmul.f32 -0.5, %v767_v21  ;;  %v520_v7 = vand.u32 2147483647, %v767_v21 }
  0xb7   :  { %v166_v58 = vadd.f32 %v165_v0, %v150_v57  ;;  %768 = vlog2.f32 %v505_v22  ;;  %v509_v26 = vadd.f32 1.0, %v508_v24  ;;  %vm512_vm5 = vcmp.lt.f32.partialorder %v511_v6, 0.0004427343 }
  0xb8   :  { %770 = vlog2.f32 %v514_v23  ;;  %v518_v27 = vadd.f32 1.0, %v517_v25  ;;  %vm521_vm6 = vcmp.lt.f32.partialorder %v520_v7, 0.0004427343  ;;  %v540_v7 = vld [vmem:[%s1262_s17] sm:$0x1] }
  0xb9   :  { %v167_v61 = vsel %vm151_vm3, %v149_v45, %v166_v58  ;;  %v510_v31 = vmul.f32 %v765_v20, %v509_v26  ;;  %v450_v45 = vld [vmem:[%s1231_s13 + $0x18] sm:$0xff]  ;;  %772 = vpow2.f32 %v351_v53 }
  0xba   :  { %v168_v62 = vmul.f32 %v167_v61, %v148_v60  ;;  %v519_v32 = vmul.f32 %v767_v21, %v518_v27  ;;  %v346_v61 = vmax.f32 %v345_v50, 0.0  ;;  %v542_v27 = vmax.f32 %v541_v16, 0.0 }
  0xbc   :  { %v169_v5 = vadd.f32 %v168_v62, %v147_v4  ;;  %v344_v4 = vld [vmem:[%s1230_s12] sm:$0x1] }
  0xbe   :  { %v174_v9 = vrot.slane %v169_v5, %v1163_v8 }
  0xc1   :  { %v769_v28 = vpop.eup %768 }
  0xc2   :  { %v771_v29 = vpop.eup %770  ;;  %v507_v30 = vmul.f32 0.6931472, %v769_v28 }
  0xc3   :  { %v516_v35 = vmul.f32 0.6931472, %v771_v29  ;;  %v773_v54 = vpop.eup %772 }
  0xc4   :  { %v513_v36 = vsel %vm512_vm5, %v510_v31, %v507_v30  ;;  %v353_v55 = vadd.f32 1.0, %v773_v54  ;;  %v356_v56 = vmul.f32 -0.5, %v773_v54  ;;  %v359_v58 = vand.u32 2147483647, %v773_v54  ;;  %v539_v31 = vld [vmem:[%s1263_s25] sm:$0x1] }
  0xc5   :  { %v522_v37 = vsel %vm521_vm6, %v519_v32, %v516_v35  ;;  %v525_v1 = vadd.f32 %v513_v36, %v461_v33 }
  0xc6   :  { %v526_v38 = vadd.f32 %v522_v37, %v462_v34  ;;  %774 = vlog2.f32 %v353_v55  ;;  %v357_v57 = vadd.f32 1.0, %v356_v56  ;;  %vm360_vm9 = vcmp.lt.f32.partialorder %v359_v58, 0.0004427343 }
  0xc7   :  { %v529_v41 = vsel %vm465_vm7, %v457_v13, %v525_v1  ;;  %776 = vpow2.f32 %v547_v18 }
  0xc8   :  { %v530_v42 = vsel %vm466_vm8, %v458_v14, %v526_v38  ;;  %v533_v43 = vmul.f32 %v529_v41, %v453_v39  ;;  %v358_v60 = vmul.f32 %v773_v54, %v357_v57 }
  0xc9   :  { %v534_v46 = vmul.f32 %v530_v42, %v454_v40 }
  0xca   :  { %v537_v47 = vadd.f32 %v533_v43, %v449_v44 }
  0xcb   :  { %v538_v48 = vadd.f32 %v534_v46, %v450_v45 }
  0xcd   :  { %v717_v49 = vpack.c.bf16 %v538_v48, %v537_v47 }
  0xcf   :  { %718 = vmatpush3.bf16.msra.mxu0 %v717_v49 }
  0xd0   :  { %v775_v0 = vpop.eup %774 }
  0xd1   :  { %v355_v59 = vmul.f32 0.6931472, %v775_v0  ;;  %v777_v19 = vpop.eup %776 }
  0xd2   :  { %v549_v20 = vadd.f32 1.0, %v777_v19  ;;  %v552_v21 = vmul.f32 -0.5, %v777_v19  ;;  %v555_v24 = vand.u32 2147483647, %v777_v19 }
  0xd3   :  { %v361_v62 = vsel %vm360_vm9, %v358_v60, %v355_v59 }
  0xd4   :  { %v362_v63 = vadd.f32 %v361_v62, %v346_v61  ;;  %778 = vlog2.f32 %v549_v20  ;;  %v553_v22 = vadd.f32 1.0, %v552_v21  ;;  %vm556_vm11 = vcmp.lt.f32.partialorder %v555_v24, 0.0004427343 }
  0xd6   :  { %v363_v5 = vsel %vm347_vm10, %v345_v50, %v362_v63  ;;  %v554_v26 = vmul.f32 %v777_v19, %v553_v22 }
  0xde   :  { %v779_v23 = vpop.eup %778 }
  0xdf   :  { %v551_v25 = vmul.f32 0.6931472, %v779_v23 }
  0xe1   :  { %v557_v28 = vsel %vm556_vm11, %v554_v26, %v551_v25 }
  0xe2   :  { %v558_v6 = vadd.f32 %v557_v28, %v542_v27 }
  0xe4   :  { %v559_v29 = vsel %vm543_vm12, %v541_v16, %v558_v6 }
  0xe5   :  { %v560_v30 = vmul.f32 %v559_v29, %v540_v7 }
  0xe7   :  { %v561_v32 = vadd.f32 %v560_v30, %v539_v31 }
  0xe9   :  { %v566_v33 = vrot.slane %v561_v32, %v1163_v8 }
 0x14c   :  { %v246_v10 = vpop.f32.mrb[0].mxu0 }
 0x14d   :  { %v247_v11 = vadd.f32 %v246_v10, %v174_v9  ;;  %v681_v2 = vpop.f32.mrb[1].mxu0  ;;  %v364_v9 = vmul.f32 %v363_v5, %v344_v4  ;;  %v343_v10 = vld [vmem:[%s1228_s10] sm:$0x1] }
 0x14f   :  { %v250_v12 = vmax.f32 %v247_v11, 0.0  ;;  %v365_v11 = vadd.f32 %v364_v9, %v343_v10 }
 0x151   :  { %691 = vmatmul.mubr.msk.f32.vlgmr.msra.gmra.mrb[0].mxu1 %vm372_vm4, %v250_v12  ;;  %v370_v2 = vrot.slane %v365_v11, %v1163_v8 }
 0x224   :  { %v442_v12 = vpop.f32.mrb[0].mxu1 }
 0x225   :  { %v443_v13 = vadd.f32 %v442_v12, %v370_v2  ;;  %v692_v14 = vpop.f32.mrb[1].mxu1 }
 0x227   :  { %v446_v15 = vmax.f32 %v443_v13, 0.0 }
 0x229   :  { %702 = vmatmul.mubr.msk.f32.vlgmr.msra.gmra.mrb[2].mxu0 %vm372_vm4, %v446_v15 }
 0x2fc   :  { %v637_v34 = vpop.f32.mrb[2].mxu0 }
 0x2fd   :  { %v638_v35 = vadd.f32 %v637_v34, %v566_v33  ;;  %v703_v36 = vpop.f32.mrb[3].mxu0 }
 0x2ff   :  { %642 = vst.msk [vmem:[#allocation8] sm:$0xff] %vm641_vm13, %v638_v35 }
 0x300   :  { %857 = shalt.err (!%p854_p0)
}
 0x301   :  { %s1264_s26 = sld [smem:[#allocation18_spill]] }
 0x307   :  { %s858_s19 = scalar_lea.hbm %s1264_s26, 128 }
 0x308   :  { %p859_p1 = scmp.ne.s32.totalorder %s1264_s26, %s858_s19  ;;  %p862_p2 = scmp.lt.u32.totalorder %s858_s19, %s1264_s26 }
 0x30a   :  { %p864_p3 = pnand %p862_p2, %p859_p1 }
 0x30c   :  { %867 = shalt.err (!%p864_p3)
}
 0x30d   :  { %652 = dma.vmem_to_hbm [thread:$0]  %s650_s30, 128, %s1264_s26, [#allocation4]  }
 0x30e   :  { %872 = dma.done.wait [#allocation4], 128  }
 0x30f   :  { %873 = vsyncadd [#allocation4], 4294967168 }
 0x310   :  { %656 = vsyncpa [#allocation3], 1 }
 0x311   :  { %657 = vsyncpa [#allocation6], 1 }
 0x312   :  { %658 = vsyncpa [#allocation4], 1 }

</bundles_post_ra>
